<compile_context>
chip_gen: v7x
topology: tpu7x:2x2x1
jax: 0.10.0
libtpu: 0.0.40
codegen_flags: <defaults>
</compile_context>

<pallas_src>
import functools

import jax
import jax.numpy as jnp
from jax.experimental import pallas as pl
from jax.experimental.pallas import tpu as pltpu


def _round_up(x: int, m: int) -> int:
    return ((x + m - 1) // m) * m


# ----------------------------------------------------------------------------
# Kernels
# ----------------------------------------------------------------------------
def _head_kernel_fused(x_ref, w_ref, b_ref, o_ref):
    """No reduction grid axis: one MXU dot per (tm, tn) tile, bias fused.

    x_ref: (tm, Hp) bf16   w_ref: (Hp, tn) bf16   b_ref: (1, tn) f32
    o_ref: (tm, tn) f32
    """
    o_ref[...] = (
        jnp.dot(x_ref[...], w_ref[...], preferred_element_type=jnp.float32)
        + b_ref[...].astype(jnp.float32))


def _head_kernel_ksplit(x_ref, w_ref, b_ref, o_ref):
    """K-tiled variant for very large H: accumulate directly into the resident
    f32 output block (no scratch, no epilogue copy). Bias folded into k==0 init.
    """
    k = pl.program_id(2)

    @pl.when(k == 0)
    def _():
        o_ref[...] = jnp.broadcast_to(
            b_ref[...].astype(jnp.float32), o_ref.shape)

    o_ref[...] += jnp.dot(x_ref[...], w_ref[...],
                          preferred_element_type=jnp.float32)


# ----------------------------------------------------------------------------
# One-time parameter packing (pad + bf16 cast hoisted out of the forward path)
# ----------------------------------------------------------------------------
def prepack_head_params(params: dict, num_classes: int, *,
                        tn_max: int = 256, tk_max: int = 4096,
                        tk_split: int = 2048) -> dict:
    w = jnp.asarray(params["w"])                 # [H, C]
    b = jnp.asarray(params["b"])                 # [C] or [1, C]
    H, C = w.shape
    assert C == num_classes, "weight out-dim must equal num_classes"
    assert b.size == C, "bias must have num_classes elements"
    b = jnp.reshape(b, (1, C)).astype(jnp.float32)

    tn = min(tn_max, _round_up(C, 128))          # lane-dense output tiles
    Cp = _round_up(C, tn)

    if H <= tk_max:
        tk = _round_up(H, 128)                   # single K block -> no K axis
    else:
        tk = tk_split                            # K-tiled path
    Hp = _round_up(H, tk)

    w_p = w if (Hp, Cp) == (H, C) else jnp.pad(w, ((0, Hp - H), (0, Cp - C)))
    w_p = w_p.astype(jnp.bfloat16)
    b_p = b if Cp == C else jnp.pad(b, ((0, 0), (0, Cp - C)))

    return {"w_p": w_p, "b_p": b_p, "H": H, "C": C, "tn": tn, "tk": tk}


# ----------------------------------------------------------------------------
# Pallas forward
# ----------------------------------------------------------------------------
@functools.partial(jax.jit, static_argnames=("C", "tn", "tk", "tm_max"))
def _logits_pallas(x, w_p, b_p, C, tn, tk, tm_max=128):
    B, H = x.shape
    Hp, Cp = w_p.shape

    # tm: bf16-native sublane multiple; 128 gives >= 2 M blocks at B >= 256
    # so the leading "parallel" axis feeds both v7x TensorCores.
    tm = min(tm_max, _round_up(B, 16))
    Bp = _round_up(B, tm)

    x_p = x
    if (Bp, Hp) != (B, H):
        x_p = jnp.pad(x, ((0, Bp - B), (0, Hp - H)))
    x_p = x_p.astype(jnp.bfloat16)

    n_k = Hp // tk
    cost = pl.CostEstimate(
        flops=2 * Bp * Hp * Cp,
        transcendentals=0,
        bytes_accessed=x_p.size * 2 + w_p.size * 2 + b_p.size * 4 + Bp * Cp * 4,
    )

    if n_k == 1:
        # Fast path: no reduction axis, no scratch, no pl.when.
        logits_p = pl.pallas_call(
            _head_kernel_fused,
            out_shape=jax.ShapeDtypeStruct((Bp, Cp), jnp.float32),
            grid_spec=pltpu.PrefetchScalarGridSpec(
                num_scalar_prefetch=0,
                grid=(Bp // tm, Cp // tn),
                in_specs=[
                    pl.BlockSpec((tm, Hp), lambda i, j: (i, 0)),   # x
                    pl.BlockSpec((Hp, tn), lambda i, j: (0, j)),   # w
                    pl.BlockSpec((1, tn), lambda i, j: (0, j)),    # bias
                ],
                out_specs=pl.BlockSpec((tm, tn), lambda i, j: (i, j)),
            ),
            compiler_params=pltpu.CompilerParams(
                dimension_semantics=("parallel", "parallel")),
            cost_estimate=cost,
        )(x_p, w_p, b_p)
    else:
        # Large-H path: K axis last ("arbitrary"), accumulate into o_ref.
        logits_p = pl.pallas_call(
            _head_kernel_ksplit,
            out_shape=jax.ShapeDtypeStruct((Bp, Cp), jnp.float32),
            grid_spec=pltpu.PrefetchScalarGridSpec(
                num_scalar_prefetch=0,
                grid=(Bp // tm, Cp // tn, n_k),
                in_specs=[
                    pl.BlockSpec((tm, tk), lambda i, j, k: (i, k)),   # x
                    pl.BlockSpec((tk, tn), lambda i, j, k: (k, j)),   # w
                    pl.BlockSpec((1, tn), lambda i, j, k: (0, j)),    # bias
                ],
                out_specs=pl.BlockSpec((tm, tn), lambda i, j, k: (i, j)),
            ),
            compiler_params=pltpu.CompilerParams(
                dimension_semantics=("parallel", "parallel", "arbitrary")),
            cost_estimate=cost,
        )(x_p, w_p, b_p)

    # TODO(synk): for very small C, optionally return the padded (Bp, Cp)
    # logits and let the consumer fuse the slice (saves one small HBM pass).
    return logits_p[:B, :C]


# ----------------------------------------------------------------------------
# BaseModel.forward realization: sample dict -> output dict
# ----------------------------------------------------------------------------
def base_model_forward(sample: dict, packed_params: dict, num_classes: int,
                       *, force_pallas: bool = False) -> dict:
    x = sample["features"]                      # [B, H]
    H, C = packed_params["H"], packed_params["C"]
    assert C == num_classes

    B = x.shape[0]
    tiny = (2 * B * H * C) < (1 << 22)          # < ~4 MFLOPs: overhead-bound
    if tiny and not force_pallas:
        # XLA fused matmul+bias wins outright at these sizes.
        logits = jnp.dot(x.astype(jnp.bfloat16), packed_params["w_p"][:H, :C],
                         preferred_element_type=jnp.float32)
        logits = logits + packed_params["b_p"][:, :C]
        return {"logits": logits}

    logits = _logits_pallas(x, packed_params["w_p"], packed_params["b_p"],
                            C, packed_params["tn"], packed_params["tk"])
    return {"logits": logits}


def get_forward_output_keys() -> list:
    return ["logits"]


def get_forward_input_keys() -> list:
    return ["features"]


if __name__ == "__main__":
    num_classes = 16
    B, H = 256, 1024   # small, but enough to exercise the tiled Pallas path

    key = jax.random.PRNGKey(0)
    kx, kw, kb, kt = jax.random.split(key, 4)

    # Deterministic synthetic parameters (no checkpoint loading).
    params = {
        "w": jax.random.normal(kw, (H, num_classes), dtype=jnp.float32) * 0.02,
        "b": jax.random.normal(kb, (1, num_classes), dtype=jnp.float32) * 0.01,
    }
    packed = prepack_head_params(params, num_classes)

    sample = {"features": jax.random.normal(kx, (B, H), dtype=jnp.float32)}

    # --- Pallas path ---------------------------------------------------------
    out = base_model_forward(sample, packed, num_classes, force_pallas=True)
    logits = jax.block_until_ready(out["logits"])

    # Reference with the same bf16-operand / f32-accumulate numerics.
    x_bf = sample["features"].astype(jnp.bfloat16)
    w_bf = params["w"].astype(jnp.bfloat16)
    ref = jnp.dot(x_bf, w_bf, preferred_element_type=jnp.float32) + params["b"]

    assert logits.shape == (B, num_classes)
    assert jnp.allclose(logits, ref, atol=1e-2, rtol=1e-2)

    # --- tiny-shape XLA fallback path ---------------------------------------
    tiny_sample = {"features": jax.random.normal(kt, (8, H), dtype=jnp.float32)}
    tiny_out = base_model_forward(tiny_sample, packed, num_classes)
    tiny_logits = jax.block_until_ready(tiny_out["logits"])
    tiny_ref = jnp.dot(tiny_sample["features"].astype(jnp.bfloat16), w_bf,
                       preferred_element_type=jnp.float32) + params["b"]
    assert tiny_logits.shape == (8, num_classes)
    assert jnp.allclose(tiny_logits, tiny_ref, atol=1e-2, rtol=1e-2)

    print("KERNEL_OK")
</pallas_src>

<mosaic_0001>
module attributes {stable_mosaic.version = 11 : i64} {
  func.func @_head_kernel_fused(%arg0: i32, %arg1: i32, %arg2: memref<128x1024xbf16, #tpu.memory_space<vmem>>, %arg3: memref<1024x128xbf16, #tpu.memory_space<vmem>>, %arg4: memref<1x128xf32, #tpu.memory_space<vmem>>, %arg5: memref<128x128xf32, #tpu.memory_space<vmem>>) attributes {dimension_semantics = [#tpu.dimension_semantics<parallel>, #tpu.dimension_semantics<parallel>], iteration_bounds = array<i64: 2, 1>, scalar_prefetch = 0 : i64, scratch_operands = 0 : i64, tpu.core_type = #tpu.core_type<tc>, window_params = [{transform_indices = @transform_0, window_bounds = array<i64: 128, 1024>}, {transform_indices = @transform_1, window_bounds = array<i64: 1024, 128>}, {transform_indices = @transform_2, window_bounds = array<i64: 1, 128>}, {transform_indices = @transform_3, window_bounds = array<i64: 128, 128>}]} {
    %c0 = arith.constant 0 : index
    %c0_0 = arith.constant 0 : index
    %0 = vector.load %arg2[%c0, %c0_0] : memref<128x1024xbf16, #tpu.memory_space<vmem>>, vector<128x1024xbf16>
    %c0_1 = arith.constant 0 : index
    %c0_2 = arith.constant 0 : index
    %1 = vector.load %arg3[%c0_1, %c0_2] : memref<1024x128xbf16, #tpu.memory_space<vmem>>, vector<1024x128xbf16>
    %cst = arith.constant dense<0.000000e+00> : vector<128x128xf32>
    %2 = tpu.matmul %0, %1, %cst {dimension_numbers = #tpu.dot_dimension_numbers<[1], [0], [0], [1], [0, 0, 1, 1], [], []>} : vector<128x1024xbf16>, vector<1024x128xbf16>, vector<128x128xf32> -> vector<128x128xf32>
    %c0_3 = arith.constant 0 : index
    %c0_4 = arith.constant 0 : index
    %3 = vector.load %arg4[%c0_3, %c0_4] : memref<1x128xf32, #tpu.memory_space<vmem>>, vector<1x128xf32>
    %4 = vector.broadcast %3 : vector<1x128xf32> to vector<128x128xf32>
    %5 = arith.addf %2, %4 : vector<128x128xf32>
    %c0_5 = arith.constant 0 : index
    %c0_6 = arith.constant 0 : index
    %6 = vector.load %arg5[%c0_5, %c0_6] : memref<128x128xf32, #tpu.memory_space<vmem>>, vector<128x128xf32>
    tpu.vector_store %arg5[%c0_5, %c0_6], %5 {strides = array<i32>} : memref<128x128xf32, #tpu.memory_space<vmem>>, vector<128x128xf32>,
    return
  }
  func.func @transform_0(%arg0: i32, %arg1: i32) -> (i32, i32) {
    %c0_i32 = arith.constant 0 : i32
    %c0_i32_0 = arith.constant 0 : i32
    return %arg0, %c0_i32 : i32, i32
  }
  func.func @transform_1(%arg0: i32, %arg1: i32) -> (i32, i32) {
    %c0_i32 = arith.constant 0 : i32
    %c0_i32_0 = arith.constant 0 : i32
    return %c0_i32, %arg1 : i32, i32
  }
  func.func @transform_2(%arg0: i32, %arg1: i32) -> (i32, i32) {
    %c0_i32 = arith.constant 0 : i32
    %c0_i32_0 = arith.constant 0 : i32
    return %c0_i32, %arg1 : i32, i32
  }
  func.func @transform_3(%arg0: i32, %arg1: i32) -> (i32, i32) {
    %c0_i32 = arith.constant 0 : i32
    return %arg0, %arg1 : i32, i32
  }
}

</mosaic_0001>

<bundles_post_ra>
// kernel: _logits_pallas.1
= control target key start
LH: loop header
LB: loop body
LE: loop exit
PB: predicated region body
PF: predicated region fallthrough
CT: control target
= control target key end

     0   :  { %s2170_s12 = smov 0   ;;  %s2172_s13 = smov 0   ;;  %s2555_s0 = inlined_call_operand.vmem [shape: bf16[256,1024], index: 0, kind: input, shape index: {}]   ;;  %s2556_s1 = inlined_call_operand.vmem [shape: bf16[1024,128], index: 1, kind: input, shape index: {}]   ;;  %s2557_s2 = inlined_call_operand.vmem [shape: f32[1,128], index: 2, kind: input, shape index: {}]   ;;  %s2558_s3 = inlined_call_operand.vmem [shape: f32[256,128], index: 3, kind: output, shape index: {}]  }
   0x1   :  { %s2174_s14 = smov 0  }
   0x2 LB: > { %s25_s15 = sadd.s32 1, %s2144_s13  ;;  %p1644_p0 = scmp.ge.s32.totalorder %s2148_s14, 1  ;;  %s2148_s14 = sphi %s2174_s14, %s13_s14   ;;  %s2144_s13 = sphi %s2172_s13, %s2560_s13   ;;  %s2140_s12 = sphi %s2170_s12, %s2559_s12  }
   0x3   : > { %p27_p1 = scmp.ge.s32.totalorder %s25_s15, 2  ;;  %p170_p2 = scmp.lt.s32.totalorder %s2148_s14, 3 }
   0x5   : > { %s2562_s15 = smov (%p27_p1, %s25_s15), 0  ;;  %p171_p3 = pnand %p1644_p0, %p170_p2 }
   0x6   : > { %v2062_v0 = vld [vmem:[%s2556_s1 + $0x40] sm:$0xff] (!%p171_p3)   ;;  %v2066_v4 = vld [vmem:[%s2556_s1 + $0x48] sm:$0xff] (!%p171_p3)   ;;  %v2070_v8 = vld [vmem:[%s2556_s1 + $0x50] sm:$0xff] (!%p171_p3)   ;;  %s1645_s25 = sshll.u32 (!%p171_p3), %s2140_s12, 4 }
   0x7   : > { %174 = sbr.rel (%p171_p3) target bundleno = 382 (0x17e), region = 32  ;;  %v2063_v1 = vld [vmem:[%s2556_s1 + $0xc0] sm:$0xff] (!%p171_p3)   ;;  %1782 = vmatprep.subr.bf16.mxu0 (!%p171_p3), %v2062_v0  ;;  %v2067_v5 = vld [vmem:[%s2556_s1 + $0xc8] sm:$0xff] (!%p171_p3)   ;;  %v2071_v9 = vld [vmem:[%s2556_s1 + $0xd0] sm:$0xff] (!%p171_p3)   ;;  %p206_p4 = scmp.lt.s32.totalorder (!%p171_p3), %s1645_s25, 31 }
   0x8   : > { %v2064_v2 = vld [vmem:[%s2556_s1] sm:$0xff] (!%p171_p3)   ;;  %1846 = vmatprep.subr.bf16.mxu1 (!%p171_p3), %v2063_v1  ;;  %v2068_v6 = vld [vmem:[%s2556_s1 + $0x8] sm:$0xff] (!%p171_p3)   ;;  %v2072_v10 = vld [vmem:[%s2556_s1 + $0x10] sm:$0xff] (!%p171_p3)  }
   0x9   : > { %v2065_v3 = vld [vmem:[%s2556_s1 + $0x80] sm:$0xff] (!%p171_p3)   ;;  %1783 = vmatpush3.bf16.msra.mxu0 (!%p171_p3), %v2064_v2  ;;  %v2069_v7 = vld [vmem:[%s2556_s1 + $0x88] sm:$0xff] (!%p171_p3)   ;;  %v2073_v11 = vld [vmem:[%s2556_s1 + $0x90] sm:$0xff] (!%p171_p3)  }
   0xa   : > { %1847 = vmatpush3.bf16.msra.mxu1 (!%p171_p3), %v2065_v3  ;;  %1784 = vmatprep.subr.bf16.mxu0 (!%p171_p3), %v2066_v4  ;;  %v2074_v12 = vld [vmem:[%s2556_s1 + $0x58] sm:$0xff] (!%p171_p3)   ;;  %v2078_v16 = vld [vmem:[%s2556_s1 + $0x60] sm:$0xff] (!%p171_p3)   ;;  %v2082_v20 = vld [vmem:[%s2556_s1 + $0x68] sm:$0xff] (!%p171_p3)  }
   0xb   : > { %1848 = vmatprep.subr.bf16.mxu1 (!%p171_p3), %v2067_v5  ;;  %v2075_v13 = vld [vmem:[%s2556_s1 + $0xd8] sm:$0xff] (!%p171_p3)   ;;  %v2079_v17 = vld [vmem:[%s2556_s1 + $0xe0] sm:$0xff] (!%p171_p3)   ;;  %v2083_v21 = vld [vmem:[%s2556_s1 + $0xe8] sm:$0xff] (!%p171_p3)  }
   0xc   : > { %v2076_v14 = vld [vmem:[%s2556_s1 + $0x18] sm:$0xff] (!%p171_p3)   ;;  %v2080_v18 = vld [vmem:[%s2556_s1 + $0x20] sm:$0xff] (!%p171_p3)   ;;  %v2084_v22 = vld [vmem:[%s2556_s1 + $0x28] sm:$0xff] (!%p171_p3)  }
   0xd   : > { %1785 = vmatpush3.bf16.msra.mxu0 (!%p171_p3), %v2068_v6  ;;  %v2077_v15 = vld [vmem:[%s2556_s1 + $0x98] sm:$0xff] (!%p171_p3)   ;;  %v2081_v19 = vld [vmem:[%s2556_s1 + $0xa0] sm:$0xff] (!%p171_p3)   ;;  %v2085_v23 = vld [vmem:[%s2556_s1 + $0xa8] sm:$0xff] (!%p171_p3)  }
   0xe   : > { %1849 = vmatpush3.bf16.msra.mxu1 %v2069_v7  ;;  %1786 = vmatprep.subr.bf16.mxu0 %v2070_v8  ;;  %s2564_s25 = smov (!%p206_p4, %s1645_s25), 31  ;;  %v2086_v24 = vld [vmem:[%s2556_s1 + $0x70] sm:$0xff]   ;;  %v2090_v28 = vld [vmem:[%s2556_s1 + $0x78] sm:$0xff]   ;;  %v2094_v40 = vld [vmem:[%s2556_s1 + $0x140] sm:$0xff]  }
   0xf   : > { %1850 = vmatprep.subr.bf16.mxu1 %v2071_v9  ;;  %v2087_v25 = vld [vmem:[%s2556_s1 + $0xf0] sm:$0xff]   ;;  %s1781_s24 = sshll.u32 %s2564_s25, 5  ;;  %v2091_v29 = vld [vmem:[%s2556_s1 + $0xf8] sm:$0xff]   ;;  %v2095_v41 = vld [vmem:[%s2556_s1 + $0x100] sm:$0xff]  }
  0x10   : > { %v2088_v26 = vld [vmem:[%s2556_s1 + $0x30] sm:$0xff]   ;;  %s2287_s12 = scalar_lea.vmem %s2555_s0, %s1781_s24  ;;  %v2092_v30 = vld [vmem:[%s2556_s1 + $0x38] sm:$0xff]   ;;  %v2096_v42 = vld [vmem:[%s2556_s1 + $0x1c0] sm:$0xff]  }
  0x11   : > { %1787 = vmatpush3.bf16.msra.mxu0 %v2072_v10  ;;  %v2089_v27 = vld [vmem:[%s2556_s1 + $0xb0] sm:$0xff]   ;;  %v2093_v31 = vld [vmem:[%s2556_s1 + $0xb8] sm:$0xff]   ;;  %v229_v32 = vld [vmem:[%s2287_s12] sm:$0xff] }
  0x12   : > { %1851 = vmatpush3.bf16.msra.mxu1 %v2073_v11  ;;  %1788 = vmatprep.subr.bf16.mxu0 %v2074_v12  ;;  %v233_v33 = vld [vmem:[%s2287_s12 + $0x20] sm:$0xff]  ;;  %v230_v34 = vld [vmem:[%s2287_s12 + $0x8] sm:$0xff]  ;;  %v2102_v62 = vld [vmem:[%s2556_s1 + $0x150] sm:$0xff]  }
  0x13   : > { %1852 = vmatprep.subr.bf16.mxu1 %v2075_v13  ;;  %v1651_v35 = vcombine.low %v229_v32, %v233_v33  ;;  %v1652_v36 = vcombine.high %v229_v32, %v233_v33  ;;  %v234_v37 = vld [vmem:[%s2287_s12 + $0x28] sm:$0xff]  ;;  %v2097_v43 = vld [vmem:[%s2556_s1 + $0x180] sm:$0xff]   ;;  %v2103_v63 = vld [vmem:[%s2556_s1 + $0x110] sm:$0xff]  }
  0x14   : > { %v1653_v38 = vcombine.low %v230_v34, %v234_v37  ;;  %v1654_v39 = vcombine.high %v230_v34, %v234_v37  ;;  %v237_v44 = vld [vmem:[%s2287_s12 + $0x40] sm:$0xff]  ;;  %v238_v47 = vld [vmem:[%s2287_s12 + $0x48] sm:$0xff]  ;;  %v2104_v0 = vld [vmem:[%s2556_s1 + $0x1d0] sm:$0xff]  }
  0x15   : > { %1789 = vmatpush3.bf16.msra.mxu0 %v2076_v14  ;;  %1164 = vmatprep.mubr.bf16.mxu0 %v1652_v36  ;;  %v241_v45 = vld [vmem:[%s2287_s12 + $0x60] sm:$0xff]  ;;  %v242_v48 = vld [vmem:[%s2287_s12 + $0x68] sm:$0xff]  ;;  %v2105_v1 = vld [vmem:[%s2556_s1 + $0x190] sm:$0xff]  }
  0x16   : > { %1853 = vmatpush3.bf16.msra.mxu1 %v2077_v15  ;;  %1790 = vmatprep.subr.bf16.mxu0 %v2078_v16  ;;  %v1660_v46 = vcombine.high %v237_v44, %v241_v45  ;;  %v1662_v49 = vcombine.high %v238_v47, %v242_v48  ;;  %v2098_v50 = vld [vmem:[%s2556_s1 + $0x148] sm:$0xff]   ;;  %v1659_v51 = vcombine.low %v237_v44, %v241_v45  ;;  %v245_v56 = vld [vmem:[%s2287_s12 + $0x80] sm:$0xff]  ;;  %v2106_v10 = vld [vmem:[%s2556_s1 + $0x158] sm:$0xff]  }
  0x17   : > { %1854 = vmatprep.subr.bf16.mxu1 %v2079_v17  ;;  %1261 = vmatprep.mubr.bf16.mxu1 %v1654_v39  ;;  %v2099_v52 = vld [vmem:[%s2556_s1 + $0x108] sm:$0xff]   ;;  %v1661_v53 = vcombine.low %v238_v47, %v242_v48  ;;  %v249_v57 = vld [vmem:[%s2287_s12 + $0xa0] sm:$0xff]  ;;  %v2107_v11 = vld [vmem:[%s2556_s1 + $0x118] sm:$0xff]  }
  0x18   : > { %v2100_v54 = vld [vmem:[%s2556_s1 + $0x1c8] sm:$0xff]   ;;  %v1668_v60 = vcombine.high %v245_v56, %v249_v57  ;;  %v1667_v2 = vcombine.low %v245_v56, %v249_v57  ;;  %v253_v3 = vld [vmem:[%s2287_s12 + $0xc0] sm:$0xff]  ;;  %v2108_v12 = vld [vmem:[%s2556_s1 + $0x1d8] sm:$0xff]  }
  0x19   : > { %1791 = vmatpush3.bf16.msra.mxu0 %v2080_v18  ;;  %v2101_v55 = vld [vmem:[%s2556_s1 + $0x188] sm:$0xff]   ;;  %v257_v4 = vld [vmem:[%s2287_s12 + $0xe0] sm:$0xff]  ;;  %v2109_v13 = vld [vmem:[%s2556_s1 + $0x198] sm:$0xff]  }
  0x1a   : > { %1855 = vmatpush3.bf16.msra.mxu1 %v2081_v19  ;;  %1792 = vmatprep.subr.bf16.mxu0 %v2082_v20  ;;  %v246_v58 = vld [vmem:[%s2287_s12 + $0x88] sm:$0xff]  ;;  %v1676_v7 = vcombine.high %v253_v3, %v257_v4  ;;  %v261_v14 = vld [vmem:[%s2287_s12 + $0x100] sm:$0xff]  ;;  %v1675_v19 = vcombine.low %v253_v3, %v257_v4  ;;  %v2119_v39 = vld [vmem:[%s2556_s1 + $0x130] sm:$0xff]  }
  0x1b   : > { %1856 = vmatprep.subr.bf16.mxu1 %v2083_v21  ;;  %v250_v59 = vld [vmem:[%s2287_s12 + $0xa8] sm:$0xff]  ;;  %v265_v15 = vld [vmem:[%s2287_s12 + $0x120] sm:$0xff]  ;;  %v2123_v48 = vld [vmem:[%s2556_s1 + $0x138] sm:$0xff]  }
  0x1c   : > { %v1670_v61 = vcombine.high %v246_v58, %v250_v59  ;;  %v254_v5 = vld [vmem:[%s2287_s12 + $0xc8] sm:$0xff]  ;;  %v1669_v6 = vcombine.low %v246_v58, %v250_v59  ;;  %v2110_v18 = vld [vmem:[%s2556_s1 + $0x160] sm:$0xff]   ;;  %v1683_v34 = vcombine.low %v261_v14, %v265_v15 }
  0x1d   : > { %1793 = vmatpush3.bf16.msra.mxu0 %v2084_v22  ;;  %v258_v8 = vld [vmem:[%s2287_s12 + $0xe8] sm:$0xff]  ;;  %v2111_v20 = vld [vmem:[%s2556_s1 + $0x120] sm:$0xff]   ;;  %v1684_v22 = vcombine.high %v261_v14, %v265_v15  ;;  %v247_v14 = vld [vmem:[%s2287_s12 + $0x90] sm:$0xff] }
  0x1e   : > { %1857 = vmatpush3.bf16.msra.mxu1 %v2085_v23  ;;  %1794 = vmatprep.subr.bf16.mxu0 %v2086_v24  ;;  %v1678_v9 = vcombine.high %v254_v5, %v258_v8  ;;  %v262_v16 = vld [vmem:[%s2287_s12 + $0x108] sm:$0xff]  ;;  %v1677_v21 = vcombine.low %v254_v5, %v258_v8  ;;  %v2112_v23 = vld [vmem:[%s2556_s1 + $0x1e0] sm:$0xff]   ;;  %v240_v8 = vld [vmem:[%s2287_s12 + $0x58] sm:$0xff] }
  0x1f   : > { %1858 = vmatprep.subr.bf16.mxu1 %v2087_v25  ;;  %v266_v17 = vld [vmem:[%s2287_s12 + $0x128] sm:$0xff]  ;;  %v2113_v25 = vld [vmem:[%s2556_s1 + $0x1a0] sm:$0xff]   ;;  %v251_v15 = vld [vmem:[%s2287_s12 + $0xb0] sm:$0xff] }
  0x20   : > { %v1686_v24 = vcombine.high %v262_v16, %v266_v17  ;;  %v2116_v32 = vld [vmem:[%s2556_s1 + $0x1e8] sm:$0xff]  }
  0x21   : > { %1795 = vmatpush3.bf16.msra.mxu0 %v2088_v26  ;;  %v269_v26 = vld [vmem:[%s2287_s12 + $0x140] sm:$0xff]  ;;  %v2117_v33 = vld [vmem:[%s2556_s1 + $0x1a8] sm:$0xff]  }
  0x22   : > { %1859 = vmatpush3.bf16.msra.mxu1 %v2089_v27  ;;  %1796 = vmatprep.subr.bf16.mxu0 %v2090_v28  ;;  %v273_v27 = vld [vmem:[%s2287_s12 + $0x160] sm:$0xff]  ;;  %v2114_v28 = vld [vmem:[%s2556_s1 + $0x168] sm:$0xff]  }
  0x23   : > { %1860 = vmatprep.subr.bf16.mxu1 %v2091_v29  ;;  %v270_v29 = vld [vmem:[%s2287_s12 + $0x148] sm:$0xff]  ;;  %v1692_v36 = vcombine.high %v269_v26, %v273_v27  ;;  %v1691_v47 = vcombine.low %v269_v26, %v273_v27  ;;  %v1671_v26 = vcombine.low %v247_v14, %v251_v15 }
  0x24   : > { %v278_v44 = vld [vmem:[%s2287_s12 + $0x188] sm:$0xff] }
  0x25   : > { %1797 = vmatpush3.bf16.msra.mxu0 %v2092_v30  ;;  %v274_v30 = vld [vmem:[%s2287_s12 + $0x168] sm:$0xff] }
  0x26   : > { %1861 = vmatpush3.bf16.msra.mxu1 %v2093_v31  ;;  %1910 = vmatprep.subr.bf16.mxu0 %v2094_v40  ;;  %v2115_v31 = vld [vmem:[%s2556_s1 + $0x128] sm:$0xff]   ;;  %v1694_v37 = vcombine.high %v270_v29, %v274_v30  ;;  %v2120_v40 = vld [vmem:[%s2556_s1 + $0x1f0] sm:$0xff]  }
  0x27   : > { %1974 = vmatprep.subr.bf16.mxu1 %v2096_v42  ;;  %v281_v42 = vld [vmem:[%s2287_s12 + $0x1a0] sm:$0xff]  ;;  %v282_v45 = vld [vmem:[%s2287_s12 + $0x1a8] sm:$0xff] }
  0x28   : > { %1165 = vmatmul.mubr.bf16.vlgmr.msra.gmra.mrb[0].mxu0 %v1651_v35  ;;  %v1685_v35 = vcombine.low %v262_v16, %v266_v17  ;;  %v286_v56 = vld [vmem:[%s2287_s12 + $0x1c8] sm:$0xff]  ;;  %v1701_v59 = vcombine.low %v278_v44, %v282_v45  ;;  %v248_v16 = vld [vmem:[%s2287_s12 + $0x98] sm:$0xff] }
  0x29   : > { %1262 = vmatmul.mubr.bf16.vlgmr.msra.gmra.mrb[0].mxu1 %v1653_v38  ;;  %1911 = vmatpush3.bf16.msra.mxu0 %v2095_v41  ;;  %v2118_v38 = vld [vmem:[%s2556_s1 + $0x170] sm:$0xff]   ;;  %v277_v41 = vld [vmem:[%s2287_s12 + $0x180] sm:$0xff]  ;;  %v290_v57 = vld [vmem:[%s2287_s12 + $0x1e8] sm:$0xff] }
  0x2a   : > { %1975 = vmatpush3.bf16.msra.mxu1 %v2097_v43  ;;  %1172 = vmatprep.mubr.bf16.mxu0 %v1660_v46  ;;  %v2121_v43 = vld [vmem:[%s2556_s1 + $0x1b0] sm:$0xff]   ;;  %v2122_v46 = vld [vmem:[%s2556_s1 + $0x178] sm:$0xff]   ;;  %v1699_v58 = vcombine.low %v277_v41, %v281_v42  ;;  %v1709_v3 = vcombine.low %v286_v56, %v290_v57 }
  0x2b   : > { %1269 = vmatprep.mubr.bf16.mxu1 %v1662_v49  ;;  %1912 = vmatprep.subr.bf16.mxu0 %v2098_v50  ;;  %v1693_v49 = vcombine.low %v270_v29, %v274_v30  ;;  %v1700_v50 = vcombine.high %v277_v41, %v281_v42  ;;  %v252_v17 = vld [vmem:[%s2287_s12 + $0xb8] sm:$0xff]  ;;  %v263_v30 = vld [vmem:[%s2287_s12 + $0x110] sm:$0xff] }
  0x2c   : > { %1976 = vmatprep.subr.bf16.mxu1 %v2100_v54  ;;  %v285_v54 = vld [vmem:[%s2287_s12 + $0x1c0] sm:$0xff]  ;;  %v1673_v27 = vcombine.low %v248_v16, %v252_v17  ;;  %v276_v41 = vld [vmem:[%s2287_s12 + $0x178] sm:$0xff] }
  0x2d   : > { %1913 = vmatpush3.bf16.msra.mxu0 %v2099_v52  ;;  %v1702_v52 = vcombine.high %v278_v44, %v282_v45 }
  0x2e   : > { %1977 = vmatpush3.bf16.msra.mxu1 %v2101_v55  ;;  %1914 = vmatprep.subr.bf16.mxu0 %v2102_v62  ;;  %v289_v55 = vld [vmem:[%s2287_s12 + $0x1e0] sm:$0xff]  ;;  %v231_v62 = vld [vmem:[%s2287_s12 + $0x10] sm:$0xff] }
  0x2f   : > { %1978 = vmatprep.subr.bf16.mxu1 %v2104_v0  ;;  %v232_v0 = vld [vmem:[%s2287_s12 + $0x18] sm:$0xff] }
  0x30   : > { %1173 = vmatmul.mubr.bf16.gmra.mrb[4].mxu0 %v1659_v51  ;;  %v2124_v51 = vld [vmem:[%s2556_s1 + $0x1f8] sm:$0xff]  }
  0x31   : > { %1270 = vmatmul.mubr.bf16.gmra.mrb[4].mxu1 %v1661_v53  ;;  %1180 = vmatprep.mubr.bf16.mxu0 %v1668_v60  ;;  %v2125_v53 = vld [vmem:[%s2556_s1 + $0x1b8] sm:$0xff]   ;;  %v1708_v60 = vcombine.high %v285_v54, %v289_v55 }
  0x32   : > { %1277 = vmatprep.mubr.bf16.mxu1 %v1670_v61  ;;  %1915 = vmatpush3.bf16.msra.mxu0 %v2103_v63  ;;  %v1710_v61 = vcombine.high %v286_v56, %v290_v57  ;;  %v235_v63 = vld [vmem:[%s2287_s12 + $0x30] sm:$0xff]  ;;  %v288_v56 = vld [vmem:[%s2287_s12 + $0x1d8] sm:$0xff] }
  0x33   : > { %1979 = vmatpush3.bf16.msra.mxu1 %v2105_v1  ;;  %1916 = vmatprep.subr.bf16.mxu0 %v2106_v10  ;;  %v236_v1 = vld [vmem:[%s2287_s12 + $0x38] sm:$0xff]  ;;  %v1656_v4 = vcombine.high %v231_v62, %v235_v63  ;;  %v1655_v10 = vcombine.low %v231_v62, %v235_v63 }
  0x34   : > { %1980 = vmatprep.subr.bf16.mxu1 %v2108_v12  ;;  %v1658_v5 = vcombine.high %v232_v0, %v236_v1  ;;  %v292_v57 = vld [vmem:[%s2287_s12 + $0x1f8] sm:$0xff] }
  0x35   : > { %v1713_v63 = vcombine.low %v288_v56, %v292_v57 }
  0x36   : > { %1917 = vmatpush3.bf16.msra.mxu0 %v2107_v11  ;;  %v1657_v11 = vcombine.low %v232_v0, %v236_v1 }
  0x37   : > { %1981 = vmatpush3.bf16.msra.mxu1 %v2109_v13  ;;  %1918 = vmatprep.subr.bf16.mxu0 %v2110_v18 }
  0x38   : > { %1181 = vmatmul.mubr.bf16.gmra.mrb[8].mxu0 %v1667_v2  ;;  %1982 = vmatprep.subr.bf16.mxu1 %v2112_v23  ;;  %v1707_v2 = vcombine.low %v285_v54, %v289_v55  ;;  %v259_v23 = vld [vmem:[%s2287_s12 + $0xf0] sm:$0xff] }
  0x39   : > { %1278 = vmatmul.mubr.bf16.gmra.mrb[8].mxu1 %v1669_v6  ;;  %1188 = vmatprep.mubr.bf16.mxu0 %v1676_v7  ;;  %v239_v6 = vld [vmem:[%s2287_s12 + $0x50] sm:$0xff] }
  0x3a   : > { %1285 = vmatprep.mubr.bf16.mxu1 %v1678_v9  ;;  %1919 = vmatpush3.bf16.msra.mxu0 %v2111_v20  ;;  %v243_v7 = vld [vmem:[%s2287_s12 + $0x70] sm:$0xff]  ;;  %v244_v9 = vld [vmem:[%s2287_s12 + $0x78] sm:$0xff]  ;;  %v1672_v20 = vcombine.high %v247_v14, %v251_v15 }
  0x3b   : > { %1983 = vmatpush3.bf16.msra.mxu1 %v2113_v25  ;;  %1920 = vmatprep.subr.bf16.mxu0 %v2114_v28  ;;  %v1664_v12 = vcombine.high %v239_v6, %v243_v7  ;;  %v1666_v13 = vcombine.high %v240_v8, %v244_v9  ;;  %v1663_v18 = vcombine.low %v239_v6, %v243_v7  ;;  %v260_v25 = vld [vmem:[%s2287_s12 + $0xf8] sm:$0xff]  ;;  %v287_v54 = vld [vmem:[%s2287_s12 + $0x1d0] sm:$0xff] }
  0x3c   : > { %1984 = vmatprep.subr.bf16.mxu1 %v2116_v32  ;;  %v264_v32 = vld [vmem:[%s2287_s12 + $0x118] sm:$0xff]  ;;  %v291_v55 = vld [vmem:[%s2287_s12 + $0x1f0] sm:$0xff] }
  0x3d   : > { %v1711_v62 = vcombine.low %v287_v54, %v291_v55 }
  0x3e   : > { %1921 = vmatpush3.bf16.msra.mxu0 %v2115_v31  ;;  %v267_v31 = vld [vmem:[%s2287_s12 + $0x130] sm:$0xff] }
  0x3f   : > { %1985 = vmatpush3.bf16.msra.mxu1 %v2117_v33  ;;  %1922 = vmatprep.subr.bf16.mxu0 %v2118_v38  ;;  %v268_v33 = vld [vmem:[%s2287_s12 + $0x138] sm:$0xff]  ;;  %v271_v38 = vld [vmem:[%s2287_s12 + $0x150] sm:$0xff]  ;;  %v1687_v42 = vcombine.low %v263_v30, %v267_v31 }
  0x40   : > { %1189 = vmatmul.mubr.bf16.gmra.mrb[12].mxu0 %v1675_v19  ;;  %1986 = vmatprep.subr.bf16.mxu1 %v2120_v40  ;;  %v1665_v19 = vcombine.low %v240_v8, %v244_v9  ;;  %v272_v40 = vld [vmem:[%s2287_s12 + $0x158] sm:$0xff] }
  0x41   : > { %1286 = vmatmul.mubr.bf16.gmra.mrb[12].mxu1 %v1677_v21  ;;  %1196 = vmatprep.mubr.bf16.mxu0 %v1684_v22  ;;  %v1674_v21 = vcombine.high %v248_v16, %v252_v17  ;;  %v255_v22 = vld [vmem:[%s2287_s12 + $0xd0] sm:$0xff]  ;;  %v1698_v45 = vcombine.high %v272_v40, %v276_v41 }
  0x42   : > { %1293 = vmatprep.mubr.bf16.mxu1 %v1686_v24  ;;  %1923 = vmatpush3.bf16.msra.mxu0 %v2119_v39  ;;  %v256_v24 = vld [vmem:[%s2287_s12 + $0xd8] sm:$0xff]  ;;  %v1680_v28 = vcombine.high %v255_v22, %v259_v23  ;;  %v275_v39 = vld [vmem:[%s2287_s12 + $0x170] sm:$0xff] }
  0x43   : > { %1987 = vmatpush3.bf16.msra.mxu1 %v2121_v43  ;;  %1924 = vmatprep.subr.bf16.mxu0 %v2122_v46  ;;  %v1682_v29 = vcombine.high %v256_v24, %v260_v25  ;;  %v1689_v43 = vcombine.low %v264_v32, %v268_v33  ;;  %v1696_v44 = vcombine.high %v271_v38, %v275_v39  ;;  %v279_v46 = vld [vmem:[%s2287_s12 + $0x190] sm:$0xff] }
  0x44   : > { %1988 = vmatprep.subr.bf16.mxu1 %v2124_v51  ;;  %v1697_v51 = vcombine.low %v272_v40, %v276_v41 }
  0x46   : > { %1925 = vmatpush3.bf16.msra.mxu0 %v2123_v48  ;;  %v280_v48 = vld [vmem:[%s2287_s12 + $0x198] sm:$0xff] }
  0x47   : > { %1989 = vmatpush3.bf16.msra.mxu1 %v2125_v53 }
  0x48   : > { %1197 = vmatmul.mubr.bf16.gmra.mrb[16].mxu0 %v1683_v34  ;;  %v1679_v34 = vcombine.low %v255_v22, %v259_v23 }
  0x49   : > { %1294 = vmatmul.mubr.bf16.gmra.mrb[16].mxu1 %v1685_v35  ;;  %1204 = vmatprep.mubr.bf16.mxu0 %v1692_v36  ;;  %v1681_v35 = vcombine.low %v256_v24, %v260_v25  ;;  %v1688_v36 = vcombine.high %v263_v30, %v267_v31 }
  0x4a   : > { %1301 = vmatprep.mubr.bf16.mxu1 %v1694_v37  ;;  %v1690_v37 = vcombine.high %v264_v32, %v268_v33 }
  0x50   : > { %1205 = vmatmul.mubr.bf16.gmra.mrb[20].mxu0 %v1691_v47  ;;  %v283_v47 = vld [vmem:[%s2287_s12 + $0x1b0] sm:$0xff] }
  0x51   : > { %1302 = vmatmul.mubr.bf16.gmra.mrb[20].mxu1 %v1693_v49  ;;  %1212 = vmatprep.mubr.bf16.mxu0 %v1700_v50  ;;  %v284_v49 = vld [vmem:[%s2287_s12 + $0x1b8] sm:$0xff]  ;;  %v1695_v50 = vcombine.low %v271_v38, %v275_v39  ;;  %s1649_s12 = sshll.u32 %s2564_s25, 3 }
  0x52   : > { %1309 = vmatprep.mubr.bf16.mxu1 %v1702_v52  ;;  %v1704_v52 = vcombine.high %v279_v46, %v283_v47  ;;  %v1706_v53 = vcombine.high %v280_v48, %v284_v49  ;;  %s2513_s17 = scalar_lea.vmem %s2558_s3, %s1649_s12 }
  0x58   : > { %1213 = vmatmul.mubr.bf16.gmra.mrb[24].mxu0 %v1699_v58  ;;  %v1703_v58 = vcombine.low %v279_v46, %v283_v47 }
  0x59   : > { %1310 = vmatmul.mubr.bf16.gmra.mrb[24].mxu1 %v1701_v59  ;;  %1220 = vmatprep.mubr.bf16.mxu0 %v1708_v60  ;;  %v1705_v59 = vcombine.low %v280_v48, %v284_v49  ;;  %v1712_v60 = vcombine.high %v287_v54, %v291_v55 }
  0x5a   : > { %1317 = vmatprep.mubr.bf16.mxu1 %v1710_v61  ;;  %v1714_v61 = vcombine.high %v288_v56, %v292_v57 }
  0x60   : > { %1221 = vmatmul.mubr.bf16.gmra.mrb[28].mxu0 %v1707_v2  ;;  %v2458_v2 = vld [vmem:[%s2557_s2] ss:$0 sm:$0xff] }
  0x61   : > { %1318 = vmatmul.mubr.bf16.gmra.mrb[28].mxu1 %v1709_v3  ;;  %1358 = vmatprep.mubr.bf16.mxu0 %v1656_v4 }
  0x62   : > { %1455 = vmatprep.mubr.bf16.mxu1 %v1658_v5 }
  0x68   : > { %1359 = vmatmul.mubr.bf16.vlgmr.msra.gmra.mrb[32].mxu0 %v1655_v10 }
  0x69   : > { %1456 = vmatmul.mubr.bf16.vlgmr.msra.gmra.mrb[32].mxu1 %v1657_v11  ;;  %1366 = vmatprep.mubr.bf16.mxu0 %v1664_v12 }
  0x6a   : > { %1463 = vmatprep.mubr.bf16.mxu1 %v1666_v13 }
  0x70   : > { %1367 = vmatmul.mubr.bf16.gmra.mrb[36].mxu0 %v1663_v18 }
  0x71   : > { %1464 = vmatmul.mubr.bf16.gmra.mrb[36].mxu1 %v1665_v19  ;;  %1374 = vmatprep.mubr.bf16.mxu0 %v1672_v20 }
  0x72   : > { %1471 = vmatprep.mubr.bf16.mxu1 %v1674_v21 }
  0x78   : > { %1375 = vmatmul.mubr.bf16.gmra.mrb[40].mxu0 %v1671_v26 }
  0x79   : > { %1472 = vmatmul.mubr.bf16.gmra.mrb[40].mxu1 %v1673_v27  ;;  %1382 = vmatprep.mubr.bf16.mxu0 %v1680_v28 }
  0x7a   : > { %1479 = vmatprep.mubr.bf16.mxu1 %v1682_v29 }
  0x80   : > { %1383 = vmatmul.mubr.bf16.gmra.mrb[44].mxu0 %v1679_v34 }
  0x81   : > { %1480 = vmatmul.mubr.bf16.gmra.mrb[44].mxu1 %v1681_v35  ;;  %1390 = vmatprep.mubr.bf16.mxu0 %v1688_v36 }
  0x82   : > { %1487 = vmatprep.mubr.bf16.mxu1 %v1690_v37 }
  0x88   : > { %1391 = vmatmul.mubr.bf16.gmra.mrb[48].mxu0 %v1687_v42 }
  0x89   : > { %1488 = vmatmul.mubr.bf16.gmra.mrb[48].mxu1 %v1689_v43  ;;  %1398 = vmatprep.mubr.bf16.mxu0 %v1696_v44 }
  0x8a   : > { %1495 = vmatprep.mubr.bf16.mxu1 %v1698_v45 }
  0x90   : > { %1399 = vmatmul.mubr.bf16.gmra.mrb[52].mxu0 %v1695_v50 }
  0x91   : > { %1496 = vmatmul.mubr.bf16.gmra.mrb[52].mxu1 %v1697_v51  ;;  %1406 = vmatprep.mubr.bf16.mxu0 %v1704_v52 }
  0x92   : > { %1503 = vmatprep.mubr.bf16.mxu1 %v1706_v53 }
  0x98   : > { %1407 = vmatmul.mubr.bf16.gmra.mrb[56].mxu0 %v1703_v58 }
  0x99   : > { %1504 = vmatmul.mubr.bf16.gmra.mrb[56].mxu1 %v1705_v59  ;;  %1414 = vmatprep.mubr.bf16.mxu0 %v1712_v60 }
  0x9a   : > { %1511 = vmatprep.mubr.bf16.mxu1 %v1714_v61 }
  0xa0   : > { %1415 = vmatmul.mubr.bf16.gmra.mrb[60].mxu0 %v1711_v62 }
  0xa1   : > { %1512 = vmatmul.mubr.bf16.gmra.mrb[60].mxu1 %v1713_v63 }
  0xfb   : > { %v1798_v0 = vpop.f32.mrb[0].mxu0 }
  0xfc   : > { %v1862_v1 = vpop.f32.mrb[0].mxu1  ;;  %v1799_v3 = vpop.f32.mrb[1].mxu0 }
  0xfd   : > { %v1800_v4 = vadd.f32 %v1799_v3, %v1798_v0  ;;  %v1863_v5 = vpop.f32.mrb[1].mxu1  ;;  %v1801_v6 = vpop.f32.mrb[2].mxu0 }
  0xfe   : > { %v1864_v7 = vadd.f32 %v1863_v5, %v1862_v1  ;;  %v1865_v8 = vpop.f32.mrb[2].mxu1  ;;  %v1802_v9 = vpop.f32.mrb[3].mxu0 }
  0xff   : > { %v1167_v10 = vadd.f32 %v1800_v4, %v2458_v2  ;;  %v1803_v11 = vadd.f32 %v1802_v9, %v1801_v6  ;;  %v1866_v12 = vpop.f32.mrb[3].mxu1 }
 0x100   : > { %v1867_v13 = vadd.f32 %v1866_v12, %v1865_v8 }
 0x101   : > { %v2461_v14 = vadd.f32 %v1864_v7, %v1167_v10  ;;  %v1170_v15 = vadd.f32 %v1803_v11, %v2458_v2 }
 0x103   : > { %v2464_v16 = vadd.f32 %v1867_v13, %v1170_v15  ;;  %v1804_v17 = vpop.f32.mrb[4].mxu0 }
 0x104   : > { %v1868_v18 = vpop.f32.mrb[4].mxu1  ;;  %v1805_v19 = vpop.f32.mrb[5].mxu0 }
 0x105   : > { %v1806_v20 = vadd.f32 %v1805_v19, %v1804_v17  ;;  %v1869_v21 = vpop.f32.mrb[5].mxu1  ;;  %v1807_v22 = vpop.f32.mrb[6].mxu0 }
 0x106   : > { %v1870_v23 = vadd.f32 %v1869_v21, %v1868_v18  ;;  %v1871_v24 = vpop.f32.mrb[6].mxu1  ;;  %v1808_v25 = vpop.f32.mrb[7].mxu0 }
 0x107   : > { %v1175_v26 = vadd.f32 %v1806_v20, %v2458_v2  ;;  %v1809_v27 = vadd.f32 %v1808_v25, %v1807_v22  ;;  %v1872_v28 = vpop.f32.mrb[7].mxu1 }
 0x108   : > { %v1873_v29 = vadd.f32 %v1872_v28, %v1871_v24 }
 0x109   : > { %v2467_v30 = vadd.f32 %v1870_v23, %v1175_v26  ;;  %v1178_v31 = vadd.f32 %v1809_v27, %v2458_v2 }
 0x10b   : > { %v2470_v32 = vadd.f32 %v1873_v29, %v1178_v31  ;;  %v1810_v33 = vpop.f32.mrb[8].mxu0 }
 0x10c   : > { %v1874_v34 = vpop.f32.mrb[8].mxu1  ;;  %v1811_v35 = vpop.f32.mrb[9].mxu0 }
 0x10d   : > { %v1812_v36 = vadd.f32 %v1811_v35, %v1810_v33  ;;  %v1875_v37 = vpop.f32.mrb[9].mxu1  ;;  %v1813_v38 = vpop.f32.mrb[10].mxu0 }
 0x10e   : > { %v1876_v39 = vadd.f32 %v1875_v37, %v1874_v34  ;;  %v1877_v40 = vpop.f32.mrb[10].mxu1  ;;  %v1814_v41 = vpop.f32.mrb[11].mxu0 }
 0x10f   : > { %v1183_v42 = vadd.f32 %v1812_v36, %v2458_v2  ;;  %v1815_v43 = vadd.f32 %v1814_v41, %v1813_v38  ;;  %v1878_v44 = vpop.f32.mrb[11].mxu1 }
 0x110   : > { %v1879_v45 = vadd.f32 %v1878_v44, %v1877_v40 }
 0x111   : > { %v2473_v46 = vadd.f32 %v1876_v39, %v1183_v42  ;;  %v1186_v47 = vadd.f32 %v1815_v43, %v2458_v2 }
 0x113   : > { %v2476_v48 = vadd.f32 %v1879_v45, %v1186_v47  ;;  %v1816_v49 = vpop.f32.mrb[12].mxu0 }
 0x114   : > { %v1880_v50 = vpop.f32.mrb[12].mxu1  ;;  %v1817_v51 = vpop.f32.mrb[13].mxu0 }
 0x115   : > { %v1818_v52 = vadd.f32 %v1817_v51, %v1816_v49  ;;  %v1881_v53 = vpop.f32.mrb[13].mxu1  ;;  %v1819_v54 = vpop.f32.mrb[14].mxu0 }
 0x116   : > { %v1882_v55 = vadd.f32 %v1881_v53, %v1880_v50  ;;  %v1883_v56 = vpop.f32.mrb[14].mxu1  ;;  %v1820_v57 = vpop.f32.mrb[15].mxu0 }
 0x117   : > { %v1191_v58 = vadd.f32 %v1818_v52, %v2458_v2  ;;  %v1821_v59 = vadd.f32 %v1820_v57, %v1819_v54  ;;  %v1884_v60 = vpop.f32.mrb[15].mxu1 }
 0x118   : > { %v1885_v61 = vadd.f32 %v1884_v60, %v1883_v56 }
 0x119   : > { %v2479_v62 = vadd.f32 %v1882_v55, %v1191_v58  ;;  %v1194_v63 = vadd.f32 %v1821_v59, %v2458_v2 }
 0x11b   : > { %v2482_v0 = vadd.f32 %v1885_v61, %v1194_v63  ;;  %v1822_v1 = vpop.f32.mrb[16].mxu0 }
 0x11c   : > { %v1886_v3 = vpop.f32.mrb[16].mxu1  ;;  %v1823_v4 = vpop.f32.mrb[17].mxu0 }
 0x11d   : > { %v1824_v5 = vadd.f32 %v1823_v4, %v1822_v1  ;;  %v1887_v6 = vpop.f32.mrb[17].mxu1  ;;  %v1825_v7 = vpop.f32.mrb[18].mxu0 }
 0x11e   : > { %v1888_v8 = vadd.f32 %v1887_v6, %v1886_v3  ;;  %v1889_v9 = vpop.f32.mrb[18].mxu1  ;;  %v1826_v10 = vpop.f32.mrb[19].mxu0 }
 0x11f   : > { %v1199_v11 = vadd.f32 %v1824_v5, %v2458_v2  ;;  %v1827_v12 = vadd.f32 %v1826_v10, %v1825_v7  ;;  %v1890_v13 = vpop.f32.mrb[19].mxu1 }
 0x120   : > { %v1891_v15 = vadd.f32 %v1890_v13, %v1889_v9 }
 0x121   : > { %v2485_v17 = vadd.f32 %v1888_v8, %v1199_v11  ;;  %v1202_v18 = vadd.f32 %v1827_v12, %v2458_v2 }
 0x123   : > { %v2488_v19 = vadd.f32 %v1891_v15, %v1202_v18  ;;  %v1828_v20 = vpop.f32.mrb[20].mxu0 }
 0x124   : > { %v1892_v21 = vpop.f32.mrb[20].mxu1  ;;  %v1829_v22 = vpop.f32.mrb[21].mxu0 }
 0x125   : > { %v1830_v23 = vadd.f32 %v1829_v22, %v1828_v20  ;;  %v1893_v24 = vpop.f32.mrb[21].mxu1  ;;  %v1831_v25 = vpop.f32.mrb[22].mxu0 }
 0x126   : > { %v1894_v26 = vadd.f32 %v1893_v24, %v1892_v21  ;;  %v1895_v27 = vpop.f32.mrb[22].mxu1  ;;  %v1832_v28 = vpop.f32.mrb[23].mxu0 }
 0x127   : > { %v1207_v29 = vadd.f32 %v1830_v23, %v2458_v2  ;;  %v1833_v31 = vadd.f32 %v1832_v28, %v1831_v25  ;;  %v1896_v33 = vpop.f32.mrb[23].mxu1 }
 0x128   : > { %v1897_v34 = vadd.f32 %v1896_v33, %v1895_v27 }
 0x129   : > { %v2491_v35 = vadd.f32 %v1894_v26, %v1207_v29  ;;  %v1210_v36 = vadd.f32 %v1833_v31, %v2458_v2 }
 0x12b   : > { %v2494_v37 = vadd.f32 %v1897_v34, %v1210_v36  ;;  %v1834_v38 = vpop.f32.mrb[24].mxu0 }
 0x12c   : > { %v1898_v39 = vpop.f32.mrb[24].mxu1  ;;  %v1835_v40 = vpop.f32.mrb[25].mxu0 }
 0x12d   : > { %v1836_v41 = vadd.f32 %v1835_v40, %v1834_v38  ;;  %v1899_v42 = vpop.f32.mrb[25].mxu1  ;;  %v1837_v43 = vpop.f32.mrb[26].mxu0 }
 0x12e   : > { %v1900_v44 = vadd.f32 %v1899_v42, %v1898_v39  ;;  %v1901_v45 = vpop.f32.mrb[26].mxu1  ;;  %v1838_v47 = vpop.f32.mrb[27].mxu0 }
 0x12f   : > { %v1215_v49 = vadd.f32 %v1836_v41, %v2458_v2  ;;  %v1839_v50 = vadd.f32 %v1838_v47, %v1837_v43  ;;  %v1902_v51 = vpop.f32.mrb[27].mxu1 }
 0x130   : > { %v1903_v52 = vadd.f32 %v1902_v51, %v1901_v45 }
 0x131   : > { %v2497_v53 = vadd.f32 %v1900_v44, %v1215_v49  ;;  %v1218_v54 = vadd.f32 %v1839_v50, %v2458_v2 }
 0x133   : > { %v2500_v55 = vadd.f32 %v1903_v52, %v1218_v54  ;;  %v1840_v56 = vpop.f32.mrb[28].mxu0 }
 0x134   : > { %v1904_v57 = vpop.f32.mrb[28].mxu1  ;;  %v1841_v58 = vpop.f32.mrb[29].mxu0 }
 0x135   : > { %v1842_v59 = vadd.f32 %v1841_v58, %v1840_v56  ;;  %v1905_v60 = vpop.f32.mrb[29].mxu1  ;;  %v1843_v61 = vpop.f32.mrb[30].mxu0 }
 0x136   : > { %v1906_v63 = vadd.f32 %v1905_v60, %v1904_v57  ;;  %v1907_v1 = vpop.f32.mrb[30].mxu1  ;;  %v1844_v3 = vpop.f32.mrb[31].mxu0 }
 0x137   : > { %v1223_v4 = vadd.f32 %v1842_v59, %v2458_v2  ;;  %v1845_v5 = vadd.f32 %v1844_v3, %v1843_v61  ;;  %v1908_v6 = vpop.f32.mrb[31].mxu1 }
 0x138   : > { %v1909_v7 = vadd.f32 %v1908_v6, %v1907_v1 }
 0x139   : > { %v2503_v8 = vadd.f32 %v1906_v63, %v1223_v4  ;;  %v1226_v9 = vadd.f32 %v1845_v5, %v2458_v2 }
 0x13b   : > { %v2506_v10 = vadd.f32 %v1909_v7, %v1226_v9  ;;  %v1926_v11 = vpop.f32.mrb[32].mxu0 }
 0x13c   : > { %v1990_v12 = vpop.f32.mrb[32].mxu1  ;;  %v1927_v13 = vpop.f32.mrb[33].mxu0 }
 0x13d   : > { %v1928_v15 = vadd.f32 %v1927_v13, %v1926_v11  ;;  %v1991_v18 = vpop.f32.mrb[33].mxu1  ;;  %v1929_v20 = vpop.f32.mrb[34].mxu0 }
 0x13e   : > { %v1992_v21 = vadd.f32 %v1991_v18, %v1990_v12  ;;  %v1993_v22 = vpop.f32.mrb[34].mxu1  ;;  %v1930_v23 = vpop.f32.mrb[35].mxu0 }
 0x13f   : > { %v1361_v24 = vadd.f32 %v1928_v15, %v2461_v14  ;;  %v1931_v25 = vadd.f32 %v1930_v23, %v1929_v20  ;;  %v1994_v26 = vpop.f32.mrb[35].mxu1 }
 0x140   : > { %v1995_v2 = vadd.f32 %v1994_v26, %v1993_v22 }
 0x141   : > { %v1458_v27 = vadd.f32 %v1992_v21, %v1361_v24  ;;  %v1364_v28 = vadd.f32 %v1931_v25, %v2464_v16 }
 0x143   : > { %1520 = vst [vmem:[%s2513_s17] sm:$0xff] %v1458_v27  ;;  %v1461_v29 = vadd.f32 %v1995_v2, %v1364_v28  ;;  %v1932_v31 = vpop.f32.mrb[36].mxu0 }
 0x144   : > { %v1996_v33 = vpop.f32.mrb[36].mxu1  ;;  %v1933_v34 = vpop.f32.mrb[37].mxu0 }
 0x145   : > { %1521 = vst [vmem:[%s2513_s17 + $0x8] sm:$0xff] %v1461_v29  ;;  %v1934_v14 = vadd.f32 %v1933_v34, %v1932_v31  ;;  %v1997_v36 = vpop.f32.mrb[37].mxu1  ;;  %v1935_v38 = vpop.f32.mrb[38].mxu0 }
 0x146   : > { %v1998_v39 = vadd.f32 %v1997_v36, %v1996_v33  ;;  %v1999_v40 = vpop.f32.mrb[38].mxu1  ;;  %v1936_v41 = vpop.f32.mrb[39].mxu0 }
 0x147   : > { %v1369_v42 = vadd.f32 %v1934_v14, %v2467_v30  ;;  %v1937_v43 = vadd.f32 %v1936_v41, %v1935_v38  ;;  %v2000_v44 = vpop.f32.mrb[39].mxu1 }
 0x148   : > { %v2001_v45 = vadd.f32 %v2000_v44, %v1999_v40 }
 0x149   : > { %v1466_v16 = vadd.f32 %v1998_v39, %v1369_v42  ;;  %v1372_v47 = vadd.f32 %v1937_v43, %v2470_v32 }
 0x14b   : > { %1522 = vst [vmem:[%s2513_s17 + $0x10] sm:$0xff] %v1466_v16  ;;  %v1469_v49 = vadd.f32 %v2001_v45, %v1372_v47  ;;  %v1938_v50 = vpop.f32.mrb[40].mxu0 }
 0x14c   : > { %v2002_v51 = vpop.f32.mrb[40].mxu1  ;;  %v1939_v52 = vpop.f32.mrb[41].mxu0 }
 0x14d   : > { %1523 = vst [vmem:[%s2513_s17 + $0x18] sm:$0xff] %v1469_v49  ;;  %v1940_v54 = vadd.f32 %v1939_v52, %v1938_v50  ;;  %v2003_v56 = vpop.f32.mrb[41].mxu1  ;;  %v1941_v57 = vpop.f32.mrb[42].mxu0 }
 0x14e   : > { %v2004_v58 = vadd.f32 %v2003_v56, %v2002_v51  ;;  %v2005_v59 = vpop.f32.mrb[42].mxu1  ;;  %v1942_v30 = vpop.f32.mrb[43].mxu0 }
 0x14f   : > { %v1377_v60 = vadd.f32 %v1940_v54, %v2473_v46  ;;  %v1943_v61 = vadd.f32 %v1942_v30, %v1941_v57  ;;  %v2006_v63 = vpop.f32.mrb[43].mxu1 }
 0x150   : > { %v2007_v1 = vadd.f32 %v2006_v63, %v2005_v59 }
 0x151   : > { %v1474_v32 = vadd.f32 %v2004_v58, %v1377_v60  ;;  %v1380_v3 = vadd.f32 %v1943_v61, %v2476_v48 }
 0x153   : > { %1524 = vst [vmem:[%s2513_s17 + $0x20] sm:$0xff] %v1474_v32  ;;  %v1477_v4 = vadd.f32 %v2007_v1, %v1380_v3  ;;  %v1944_v5 = vpop.f32.mrb[44].mxu0 }
 0x154   : > { %v2008_v6 = vpop.f32.mrb[44].mxu1  ;;  %v1945_v7 = vpop.f32.mrb[45].mxu0 }
 0x155   : > { %1525 = vst [vmem:[%s2513_s17 + $0x28] sm:$0xff] %v1477_v4  ;;  %v1946_v9 = vadd.f32 %v1945_v7, %v1944_v5  ;;  %v2009_v11 = vpop.f32.mrb[45].mxu1  ;;  %v1947_v12 = vpop.f32.mrb[46].mxu0 }
 0x156   : > { %v2010_v13 = vadd.f32 %v2009_v11, %v2008_v6  ;;  %v2011_v15 = vpop.f32.mrb[46].mxu1  ;;  %v1948_v46 = vpop.f32.mrb[47].mxu0 }
 0x157   : > { %v1385_v18 = vadd.f32 %v1946_v9, %v2479_v62  ;;  %v1949_v20 = vadd.f32 %v1948_v46, %v1947_v12  ;;  %v2012_v21 = vpop.f32.mrb[47].mxu1 }
 0x158   : > { %v2013_v22 = vadd.f32 %v2012_v21, %v2011_v15 }
 0x159   : > { %v1482_v48 = vadd.f32 %v2010_v13, %v1385_v18  ;;  %v1388_v23 = vadd.f32 %v1949_v20, %v2482_v0 }
 0x15b   : > { %1526 = vst [vmem:[%s2513_s17 + $0x30] sm:$0xff] %v1482_v48  ;;  %v1485_v24 = vadd.f32 %v2013_v22, %v1388_v23  ;;  %v1950_v25 = vpop.f32.mrb[48].mxu0 }
 0x15c   : > { %v2014_v26 = vpop.f32.mrb[48].mxu1  ;;  %v1951_v2 = vpop.f32.mrb[49].mxu0 }
 0x15d   : > { %1527 = vst [vmem:[%s2513_s17 + $0x38] sm:$0xff] %v1485_v24  ;;  %v1952_v27 = vadd.f32 %v1951_v2, %v1950_v25  ;;  %v2015_v28 = vpop.f32.mrb[49].mxu1  ;;  %v1953_v29 = vpop.f32.mrb[50].mxu0 }
 0x15e   : > { %v2016_v31 = vadd.f32 %v2015_v28, %v2014_v26  ;;  %v2017_v33 = vpop.f32.mrb[50].mxu1  ;;  %v1954_v62 = vpop.f32.mrb[51].mxu0 }
 0x15f   : > { %v1393_v34 = vadd.f32 %v1952_v27, %v2485_v17  ;;  %v1955_v14 = vadd.f32 %v1954_v62, %v1953_v29  ;;  %v2018_v36 = vpop.f32.mrb[51].mxu1 }
 0x160   : > { %v2019_v38 = vadd.f32 %v2018_v36, %v2017_v33 }
 0x161   : > { %v1490_v0 = vadd.f32 %v2016_v31, %v1393_v34  ;;  %v1396_v39 = vadd.f32 %v1955_v14, %v2488_v19 }
 0x163   : > { %1528 = vst [vmem:[%s2513_s17 + $0x40] sm:$0xff] %v1490_v0  ;;  %v1493_v40 = vadd.f32 %v2019_v38, %v1396_v39  ;;  %v1956_v41 = vpop.f32.mrb[52].mxu0 }
 0x164   : > { %v2020_v42 = vpop.f32.mrb[52].mxu1  ;;  %v1957_v43 = vpop.f32.mrb[53].mxu0 }
 0x165   : > { %1529 = vst [vmem:[%s2513_s17 + $0x48] sm:$0xff] %v1493_v40  ;;  %v1958_v44 = vadd.f32 %v1957_v43, %v1956_v41  ;;  %v2021_v45 = vpop.f32.mrb[53].mxu1  ;;  %v1959_v16 = vpop.f32.mrb[54].mxu0 }
 0x166   : > { %v2022_v47 = vadd.f32 %v2021_v45, %v2020_v42  ;;  %v2023_v49 = vpop.f32.mrb[54].mxu1  ;;  %v1960_v17 = vpop.f32.mrb[55].mxu0 }
 0x167   : > { %v1401_v50 = vadd.f32 %v1958_v44, %v2491_v35  ;;  %v1961_v51 = vadd.f32 %v1960_v17, %v1959_v16  ;;  %v2024_v52 = vpop.f32.mrb[55].mxu1 }
 0x168   : > { %v2025_v54 = vadd.f32 %v2024_v52, %v2023_v49 }
 0x169   : > { %v1498_v19 = vadd.f32 %v2022_v47, %v1401_v50  ;;  %v1404_v56 = vadd.f32 %v1961_v51, %v2494_v37 }
 0x16b   : > { %1530 = vst [vmem:[%s2513_s17 + $0x50] sm:$0xff] %v1498_v19  ;;  %v1501_v57 = vadd.f32 %v2025_v54, %v1404_v56  ;;  %v1962_v58 = vpop.f32.mrb[56].mxu0 }
 0x16c   : > { %v2026_v59 = vpop.f32.mrb[56].mxu1  ;;  %v1963_v30 = vpop.f32.mrb[57].mxu0 }
 0x16d   : > { %1531 = vst [vmem:[%s2513_s17 + $0x58] sm:$0xff] %v1501_v57  ;;  %v1964_v60 = vadd.f32 %v1963_v30, %v1962_v58  ;;  %v2027_v61 = vpop.f32.mrb[57].mxu1  ;;  %v1965_v63 = vpop.f32.mrb[58].mxu0 }
 0x16e   : > { %v2028_v1 = vadd.f32 %v2027_v61, %v2026_v59  ;;  %v2029_v32 = vpop.f32.mrb[58].mxu1  ;;  %v1966_v35 = vpop.f32.mrb[59].mxu0 }
 0x16f   : > { %v1409_v3 = vadd.f32 %v1964_v60, %v2497_v53  ;;  %v1967_v4 = vadd.f32 %v1966_v35, %v1965_v63  ;;  %v2030_v5 = vpop.f32.mrb[59].mxu1 }
 0x170   : > { %v2031_v6 = vadd.f32 %v2030_v5, %v2029_v32 }
 0x171   : > { %v1506_v37 = vadd.f32 %v2028_v1, %v1409_v3  ;;  %v1412_v7 = vadd.f32 %v1967_v4, %v2500_v55 }
 0x173   : > { %1532 = vst [vmem:[%s2513_s17 + $0x60] sm:$0xff] %v1506_v37  ;;  %v1509_v9 = vadd.f32 %v2031_v6, %v1412_v7  ;;  %v1968_v11 = vpop.f32.mrb[60].mxu0 }
 0x174   : > { %v2032_v12 = vpop.f32.mrb[60].mxu1  ;;  %v1969_v13 = vpop.f32.mrb[61].mxu0 }
 0x175   : > { %1533 = vst [vmem:[%s2513_s17 + $0x68] sm:$0xff] %v1509_v9  ;;  %v1970_v15 = vadd.f32 %v1969_v13, %v1968_v11  ;;  %v2033_v46 = vpop.f32.mrb[61].mxu1  ;;  %v1971_v18 = vpop.f32.mrb[62].mxu0 }
 0x176   : > { %v2034_v20 = vadd.f32 %v2033_v46, %v2032_v12  ;;  %v2035_v21 = vpop.f32.mrb[62].mxu1  ;;  %v1972_v53 = vpop.f32.mrb[63].mxu0 }
 0x177   : > { %v1417_v22 = vadd.f32 %v1970_v15, %v2503_v8  ;;  %v1973_v48 = vadd.f32 %v1972_v53, %v1971_v18  ;;  %v2036_v23 = vpop.f32.mrb[63].mxu1 }
 0x178   : > { %v2037_v24 = vadd.f32 %v2036_v23, %v2035_v21 }
 0x179   : > { %v1514_v55 = vadd.f32 %v2034_v20, %v1417_v22  ;;  %v1420_v25 = vadd.f32 %v1973_v48, %v2506_v10 }
 0x17b   : > { %1534 = vst [vmem:[%s2513_s17 + $0x70] sm:$0xff] %v1514_v55  ;;  %v1517_v26 = vadd.f32 %v2037_v24, %v1420_v25 }
 0x17d   : > { %1535 = vst [vmem:[%s2513_s17 + $0x78] sm:$0xff] %v1517_v26 }
 0x17e PF: > { %s13_s14 = sadd.s32 1, %s2148_s14   ;;  %s2559_s12 = smov %s2144_s13 }
 0x17f   : > { %p10_p5 = scmp.ge.s32.totalorder %s13_s14, 4   ;;  %s2560_s13 = smov %s2562_s15 }
 0x181   :  { %12 = sbr.rel (!%p10_p5) target bundleno = 2 (0x2), region = 68 }

</bundles_post_ra>
